<compile_context>
chip_gen: v7x
topology: tpu7x:2x2x1
jax: 0.10.0
libtpu: 0.0.40
codegen_flags: <defaults>
</compile_context>

<pallas_src>
import math

import jax
import jax.numpy as jnp
from jax.experimental import pallas as pl
from jax.experimental.pallas import tpu as pltpu

H = 128   # hidden width 100 zero-padded to one full lane/MXU tile
K1 = 8    # layer-1 fan-in 2 zero-padded to a sublane-friendly width


def _sigmoid(z):
    # sigmoid(z) = 0.5 * (tanh(z/2) + 1): exactly one EUP (tanh) op + 2 VPU ops.
    return 0.5 * (jnp.tanh(0.5 * z) + 1.0)


def mlp_kernel(x_ref, w1_ref, b1_ref, w2_ref, b2_ref, w3_ref, b3_ref, o_ref):
    """One batch tile, feature-major layout.

    x_ref  : (K1, TM)  bf16  input features (rows 0-1) x batch-tile   (streamed)
    w1_ref : (H, K1)   bf16  layer1 weight (out, in), zero-padded     (resident)
    b1_ref : (H, 1)    f32
    w2_ref : (H, H)    bf16  layer2 weight (out, in), zero-padded     (resident)
    b2_ref : (H, 1)    f32
    w3_ref : (H, 1)    f32   layer3 weight column, zero-padded        (resident)
    b3_ref : (1, 1)    f32   scalar bias in SMEM
    o_ref  : (1, TM)   f32   lane-dense output tile
    """
    # Layer 1: bf16 MXU matmul (K=8), f32 accumulate, f32 bias add.
    h1 = jnp.dot(w1_ref[...], x_ref[...],
                 preferred_element_type=jnp.float32) + b1_ref[...]     # (H, TM) f32
    h1 = _sigmoid(h1)

    # Layer 2: one (128,128) x (128,TM) bf16 MXU matmul, f32 accumulate.
    h2 = jnp.dot(w2_ref[...], h1.astype(jnp.bfloat16),
                 preferred_element_type=jnp.float32) + b2_ref[...]     # (H, TM) f32
    h2 = _sigmoid(h2)

    # Layer 3 (N=1): VPU multiply + sublane (XLU) reduction, not a degenerate matmul.
    out = jnp.sum(w3_ref[...] * h2, axis=0, keepdims=True) + b3_ref[0, 0]
    o_ref[...] = out.astype(o_ref.dtype)                               # (1, TM)


def _round_up(n, m):
    return ((n + m - 1) // m) * m


def neural_net_forward(x, params, *, block_rows=1024):
    """x: (B, 2) float32; params in PyTorch layout:
       (W1 (100,2), b1 (100,), W2 (100,100), b2 (100,), W3 (1,100), b3 (1,)).
       Returns (B, 1) float32 with the same math as the PyTorch module
       (matmuls use bf16 operands with f32 accumulation)."""
    w1, b1, w2, b2, w3, b3 = params
    B = x.shape[0]

    # Batch tile: large (amortize per-step overhead) but capped so any splittable
    # batch yields >= 2 grid tiles -> both v7x TensorCores get work.
    tm_cap = _round_up(block_rows, 128)
    tm = min(tm_cap, _round_up(max(1, -(-B // 2)), 128))
    b_pad = _round_up(B, tm)
    grid = (b_pad // tm,)

    # Feature-major activations; zero padding keeps the math exact
    # (padded hidden rows see zero W2 columns / w3 rows; padded batch cols sliced off).
    x_t = (jnp.zeros((K1, b_pad), jnp.float32)
           .at[:2, :B].set(x.astype(jnp.float32).T)
           .astype(jnp.bfloat16))
    w1_k = jnp.zeros((H, K1), jnp.float32).at[:100, :2].set(w1).astype(jnp.bfloat16)
    b1_k = jnp.zeros((H, 1), jnp.float32).at[:100, 0].set(b1)
    w2_k = jnp.zeros((H, H), jnp.float32).at[:100, :100].set(w2).astype(jnp.bfloat16)
    b2_k = jnp.zeros((H, 1), jnp.float32).at[:100, 0].set(b2)
    w3_k = jnp.zeros((H, 1), jnp.float32).at[:100, 0].set(w3[0])
    b3_k = b3.reshape(1, 1).astype(jnp.float32)

    const = lambda i: (0, 0)  # weights: same block every step -> VMEM-resident

    flops = 2 * b_pad * (H * K1 + H * H + H)
    transcendentals = 2 * b_pad * H
    bytes_accessed = (x_t.size * 2 + w1_k.size * 2 + w2_k.size * 2
                      + (b1_k.size + b2_k.size + w3_k.size + 1 + b_pad) * 4)

    out = pl.pallas_call(
        mlp_kernel,
        out_shape=jax.ShapeDtypeStruct((1, b_pad), jnp.float32),
        grid=grid,
        in_specs=[
            pl.BlockSpec((K1, tm), lambda i: (0, i)),           # x tile, streamed over batch
            pl.BlockSpec((H, K1), const),                       # w1 (bf16)
            pl.BlockSpec((H, 1), const),                        # b1 (f32)
            pl.BlockSpec((H, H), const),                        # w2 (bf16)
            pl.BlockSpec((H, 1), const),                        # b2 (f32)
            pl.BlockSpec((H, 1), const),                        # w3 (f32)
            pl.BlockSpec(memory_space=pltpu.MemorySpace.SMEM),  # scalar b3 in SMEM
        ],
        out_specs=pl.BlockSpec((1, tm), lambda i: (0, i)),      # lane-dense output slab
        compiler_params=pltpu.CompilerParams(
            dimension_semantics=("parallel",),                  # shard batch tiles across TCs (v7x)
        ),
        cost_estimate=pl.CostEstimate(
            flops=int(flops),
            transcendentals=int(transcendentals),
            bytes_accessed=int(bytes_accessed),
        ),
    )(x_t, w1_k, b1_k, w2_k, b2_k, w3_k, b3_k)

    return out[0, :B].reshape(B, 1)


def init_params(key):
    """PyTorch-default Linear init: U[-1/sqrt(fan_in), 1/sqrt(fan_in)], (out,in) layout."""
    ks = jax.random.split(key, 6)

    def linear(kw, kb, fan_in, fan_out):
        bound = 1.0 / math.sqrt(fan_in)
        w = jax.random.uniform(kw, (fan_out, fan_in), jnp.float32, -bound, bound)
        b = jax.random.uniform(kb, (fan_out,), jnp.float32, -bound, bound)
        return w, b

    w1, b1 = linear(ks[0], ks[1], 2, 100)
    w2, b2 = linear(ks[2], ks[3], 100, 100)
    w3, b3 = linear(ks[4], ks[5], 100, 1)
    return (w1, b1, w2, b2, w3, b3)


def _ref_forward(x, params):
    """Plain-JAX f32 reference, same math as the PyTorch module."""
    w1, b1, w2, b2, w3, b3 = params
    h = jax.nn.sigmoid(x @ w1.T + b1)
    h = jax.nn.sigmoid(h @ w2.T + b2)
    return h @ w3.T + b3


if __name__ == "__main__":
    key = jax.random.PRNGKey(0)
    kx, kp = jax.random.split(key)
    params = init_params(kp)

    fwd = jax.jit(neural_net_forward)

    # B=8: tiny single-tile case; B=300: exercises batch padding + a 2-step grid.
    for B in (8, 300):
        x = jax.random.normal(jax.random.fold_in(kx, B), (B, 2), jnp.float32)
        out = fwd(x, params)
        jax.block_until_ready(out)

        ref = _ref_forward(x, params)
        assert out.shape == (B, 1)
        # bf16 MXU operands (f32 accumulate) vs pure-f32 reference: loose tolerance.
        err = float(jnp.max(jnp.abs(out - ref)))
        assert jnp.allclose(out, ref, atol=3e-2), f"mismatch vs reference at B={B}: max err {err}"

    print("KERNEL_OK")
</pallas_src>

<mosaic_0001>
module attributes {stable_mosaic.version = 11 : i64} {
  func.func @mlp_kernel(%arg0: i32, %arg1: memref<8x128xbf16, #tpu.memory_space<vmem>>, %arg2: memref<128x8xbf16, #tpu.memory_space<vmem>>, %arg3: memref<128x1xf32, #tpu.memory_space<vmem>>, %arg4: memref<128x128xbf16, #tpu.memory_space<vmem>>, %arg5: memref<128x1xf32, #tpu.memory_space<vmem>>, %arg6: memref<128x1xf32, #tpu.memory_space<vmem>>, %arg7: memref<1x1xf32, #tpu.memory_space<smem>>, %arg8: memref<1x128xf32, #tpu.memory_space<vmem>>) attributes {dimension_semantics = [#tpu.dimension_semantics<parallel>], iteration_bounds = array<i64: 1>, scalar_prefetch = 0 : i64, scratch_operands = 0 : i64, tpu.core_type = #tpu.core_type<tc>, window_params = [{transform_indices = @transform_0, window_bounds = array<i64: 8, 128>}, {pipeline_mode = #tpu.pipeline_mode<synchronous>, transform_indices = @transform_1, window_bounds = array<i64: 128, 8>}, {pipeline_mode = #tpu.pipeline_mode<synchronous>, transform_indices = @transform_2, window_bounds = array<i64: 128, 1>}, {pipeline_mode = #tpu.pipeline_mode<synchronous>, transform_indices = @transform_3, window_bounds = array<i64: 128, 128>}, {pipeline_mode = #tpu.pipeline_mode<synchronous>, transform_indices = @transform_4, window_bounds = array<i64: 128, 1>}, {pipeline_mode = #tpu.pipeline_mode<synchronous>, transform_indices = @transform_5, window_bounds = array<i64: 128, 1>}, {transform_indices = @transform_6, window_bounds = array<i64: 1, 1>}, {transform_indices = @transform_7, window_bounds = array<i64: 1, 128>}]} {
    %c0 = arith.constant 0 : index
    %c0_0 = arith.constant 0 : index
    %0 = vector.load %arg2[%c0, %c0_0] : memref<128x8xbf16, #tpu.memory_space<vmem>>, vector<128x8xbf16>
    %c0_1 = arith.constant 0 : index
    %c0_2 = arith.constant 0 : index
    %1 = vector.load %arg1[%c0_1, %c0_2] : memref<8x128xbf16, #tpu.memory_space<vmem>>, vector<8x128xbf16>
    %cst = arith.constant dense<0.000000e+00> : vector<128x128xf32>
    %2 = tpu.matmul %0, %1, %cst {dimension_numbers = #tpu.dot_dimension_numbers<[1], [0], [0], [1], [0, 0, 1, 1], [], []>} : vector<128x8xbf16>, vector<8x128xbf16>, vector<128x128xf32> -> vector<128x128xf32>
    %c0_3 = arith.constant 0 : index
    %c0_4 = arith.constant 0 : index
    %3 = vector.load %arg3[%c0_3, %c0_4] : memref<128x1xf32, #tpu.memory_space<vmem>>, vector<128x1xf32>
    %4 = vector.broadcast %3 : vector<128x1xf32> to vector<128x128xf32>
    %5 = arith.addf %2, %4 : vector<128x128xf32>
    %cst_5 = arith.constant 5.000000e-01 : f32
    %6 = vector.broadcast %cst_5 : f32 to vector<128x128xf32>
    %7 = arith.mulf %6, %5 : vector<128x128xf32>
    %8 = math.tanh %7 : vector<128x128xf32>
    %cst_6 = arith.constant 1.000000e+00 : f32
    %9 = vector.broadcast %cst_6 : f32 to vector<128x128xf32>
    %10 = arith.addf %8, %9 : vector<128x128xf32>
    %cst_7 = arith.constant 5.000000e-01 : f32
    %11 = vector.broadcast %cst_7 : f32 to vector<128x128xf32>
    %12 = arith.mulf %11, %10 : vector<128x128xf32>
    %c0_8 = arith.constant 0 : index
    %c0_9 = arith.constant 0 : index
    %13 = vector.load %arg4[%c0_8, %c0_9] : memref<128x128xbf16, #tpu.memory_space<vmem>>, vector<128x128xbf16>
    %14 = arith.truncf %12 : vector<128x128xf32> to vector<128x128xbf16>
    %cst_10 = arith.constant dense<0.000000e+00> : vector<128x128xf32>
    %15 = tpu.matmul %13, %14, %cst_10 {dimension_numbers = #tpu.dot_dimension_numbers<[1], [0], [0], [1], [0, 0, 1, 1], [], []>} : vector<128x128xbf16>, vector<128x128xbf16>, vector<128x128xf32> -> vector<128x128xf32>
    %c0_11 = arith.constant 0 : index
    %c0_12 = arith.constant 0 : index
    %16 = vector.load %arg5[%c0_11, %c0_12] : memref<128x1xf32, #tpu.memory_space<vmem>>, vector<128x1xf32>
    %17 = vector.broadcast %16 : vector<128x1xf32> to vector<128x128xf32>
    %18 = arith.addf %15, %17 : vector<128x128xf32>
    %cst_13 = arith.constant 5.000000e-01 : f32
    %19 = vector.broadcast %cst_13 : f32 to vector<128x128xf32>
    %20 = arith.mulf %19, %18 : vector<128x128xf32>
    %21 = math.tanh %20 : vector<128x128xf32>
    %cst_14 = arith.constant 1.000000e+00 : f32
    %22 = vector.broadcast %cst_14 : f32 to vector<128x128xf32>
    %23 = arith.addf %21, %22 : vector<128x128xf32>
    %cst_15 = arith.constant 5.000000e-01 : f32
    %24 = vector.broadcast %cst_15 : f32 to vector<128x128xf32>
    %25 = arith.mulf %24, %23 : vector<128x128xf32>
    %c0_16 = arith.constant 0 : index
    %c0_17 = arith.constant 0 : index
    %26 = vector.load %arg6[%c0_16, %c0_17] : memref<128x1xf32, #tpu.memory_space<vmem>>, vector<128x1xf32>
    %27 = vector.broadcast %26 : vector<128x1xf32> to vector<128x128xf32>
    %28 = arith.mulf %27, %25 : vector<128x128xf32>
    %cst_18 = arith.constant dense<0.000000e+00> : vector<128xf32>
    %29 = vector.multi_reduction <add>, %28, %cst_18 [0] : vector<128x128xf32> to vector<128xf32>
    %30 = vector.shape_cast %29 : vector<128xf32> to vector<1x128xf32>
    %c0_19 = arith.constant 0 : index
    %c0_20 = arith.constant 0 : index
    %31 = memref.load %arg7[%c0_19, %c0_20] : memref<1x1xf32, #tpu.memory_space<smem>>
    %32 = vector.broadcast %31 : f32 to vector<1x128xf32>
    %33 = arith.addf %30, %32 : vector<1x128xf32>
    %c0_21 = arith.constant 0 : index
    %c0_22 = arith.constant 0 : index
    %34 = vector.load %arg8[%c0_21, %c0_22] : memref<1x128xf32, #tpu.memory_space<vmem>>, vector<1x128xf32>
    tpu.vector_store %arg8[%c0_21, %c0_22], %33 {strides = array<i32>} : memref<1x128xf32, #tpu.memory_space<vmem>>, vector<1x128xf32>,
    return
  }
  func.func @transform_0(%arg0: i32) -> (i32, i32) {
    %c0_i32 = arith.constant 0 : i32
    %c0_i32_0 = arith.constant 0 : i32
    return %c0_i32, %arg0 : i32, i32
  }
  func.func @transform_1(%arg0: i32) -> (i32, i32) {
    %c0_i32 = arith.constant 0 : i32
    %c0_i32_0 = arith.constant 0 : i32
    %c0_i32_1 = arith.constant 0 : i32
    return %c0_i32, %c0_i32_0 : i32, i32
  }
  func.func @transform_2(%arg0: i32) -> (i32, i32) {
    %c0_i32 = arith.constant 0 : i32
    %c0_i32_0 = arith.constant 0 : i32
    %c0_i32_1 = arith.constant 0 : i32
    return %c0_i32, %c0_i32_0 : i32, i32
  }
  func.func @transform_3(%arg0: i32) -> (i32, i32) {
    %c0_i32 = arith.constant 0 : i32
    %c0_i32_0 = arith.constant 0 : i32
    %c0_i32_1 = arith.constant 0 : i32
    return %c0_i32, %c0_i32_0 : i32, i32
  }
  func.func @transform_4(%arg0: i32) -> (i32, i32) {
    %c0_i32 = arith.constant 0 : i32
    %c0_i32_0 = arith.constant 0 : i32
    %c0_i32_1 = arith.constant 0 : i32
    return %c0_i32, %c0_i32_0 : i32, i32
  }
  func.func @transform_5(%arg0: i32) -> (i32, i32) {
    %c0_i32 = arith.constant 0 : i32
    %c0_i32_0 = arith.constant 0 : i32
    %c0_i32_1 = arith.constant 0 : i32
    return %c0_i32, %c0_i32_0 : i32, i32
  }
  func.func @transform_6(%arg0: i32) -> (i32, i32) {
    %c0_i32 = arith.constant 0 : i32
    %c0_i32_0 = arith.constant 0 : i32
    %c0_i32_1 = arith.constant 0 : i32
    return %c0_i32, %c0_i32_0 : i32, i32
  }
  func.func @transform_7(%arg0: i32) -> (i32, i32) {
    %c0_i32 = arith.constant 0 : i32
    %c0_i32_0 = arith.constant 0 : i32
    return %c0_i32, %arg0 : i32, i32
  }
}

</mosaic_0001>

<bundles_post_ra>
// kernel: neural_net_forward.1
= control target key start
LH: loop header
LB: loop body
LE: loop exit
PB: predicated region body
PF: predicated region fallthrough
CT: control target
= control target key end

     0   :  { %vm206_vm0 = vcmask 1043456   ;;  %v1040_v0 = vmov 0   ;;  %vm181_vm1 = vcmask 64512   ;;  %s1305_s2 = inlined_call_operand.vmem [shape: f32[128,1], index: 2, kind: input, shape index: {}]   ;;  %s1306_s0 = inlined_call_operand.vmem [shape: bf16[8,128], index: 0, kind: input, shape index: {}]   ;;  %s1307_s1 = inlined_call_operand.vmem [shape: bf16[128,8], index: 1, kind: input, shape index: {}]   ;;  %s1308_s4 = inlined_call_operand.vmem [shape: f32[128,1], index: 4, kind: input, shape index: {}]   ;;  %s1309_s5 = inlined_call_operand.vmem [shape: f32[128,1], index: 5, kind: input, shape index: {}]   ;;  %s1310_s3 = inlined_call_operand.vmem [shape: bf16[128,128], index: 3, kind: input, shape index: {}]   ;;  %s1311_s6 = inlined_call_operand.<no memory space> [shape: f32[1,1], index: 6, kind: input, shape index: {}]   ;;  %s1312_s7 = inlined_call_operand.vmem [shape: f32[1,128], index: 7, kind: output, shape index: {}]  }
   0x1   :  { %959 = vset.pattern.permute.xlu1 %v1040_v0  ;;  %958 = vset.pattern.permute.xlu0 %v1040_v0  ;;  %v47_v1 = vld [vmem:[%s1305_s2 + $0x10] sm:$0xff]  ;;  %v45_v2 = vld [vmem:[%s1305_s2] sm:$0xff]  ;;  %v48_v6 = vld [vmem:[%s1305_s2 + $0x18] sm:$0xff] }
   0x2   :  { %v44_v3 = vld [vmem:[%s1306_s0] sm:$0xf]  ;;  %73 = vperm.xlu1 %959, %v47_v1   ;;  %63 = vperm.xlu0 %958, %v45_v2   ;;  %v46_v7 = vld [vmem:[%s1305_s2 + $0x8] sm:$0xff]  ;;  %v962_v10 = vld [vmem:[%s1307_s1 + $0x10] sm:$0xff]  }
   0x3   :  { %v208_v4 = vsel %vm206_vm0, %v44_v3, 0  ;;  %v960_v5 = vld [vmem:[%s1307_s1] sm:$0xff]   ;;  %956 = vmatprep.subr.msk.bf16.mxu0 %vm206_vm0, %v44_v3  ;;  %v961_v8 = vld [vmem:[%s1307_s1 + $0x8] sm:$0xff]   ;;  %v52_v12 = vld [vmem:[%s1305_s2 + $0x38] sm:$0xff] }
   0x4   :  { %891 = vmatpush3.bf16.msra.mxu0 %v208_v4  ;;  %892 = vmatprep.mubr.msk.bf16.mxu0 %vm181_vm1, %v960_v5  ;;  %v50_v9 = vld [vmem:[%s1305_s2 + $0x28] sm:$0xff]  ;;  %v49_v11 = vld [vmem:[%s1305_s2 + $0x20] sm:$0xff]  ;;  %v51_v13 = vld [vmem:[%s1305_s2 + $0x30] sm:$0xff] }
   0x5   :  { %v963_v14 = vld [vmem:[%s1307_s1 + $0x18] sm:$0xff]   ;;  %v964_v15 = vld [vmem:[%s1307_s1 + $0x20] sm:$0xff]   ;;  %v54_v16 = vld [vmem:[%s1305_s2 + $0x48] sm:$0xff] }
   0x6   :  { %78 = vperm.xlu1 %959, %v48_v6   ;;  %68 = vperm.xlu0 %958, %v46_v7   ;;  %v53_v17 = vld [vmem:[%s1305_s2 + $0x40] sm:$0xff]  ;;  %v56_v18 = vld [vmem:[%s1305_s2 + $0x58] sm:$0xff]  ;;  %v55_v19 = vld [vmem:[%s1305_s2 + $0x50] sm:$0xff] }
   0x7   :  { %893 = vmatmul.mubr.msk.bf16.vlgmr.msra.gmra.mrb[0].mxu0 %vm181_vm1, %v961_v8  ;;  %v965_v20 = vld [vmem:[%s1307_s1 + $0x28] sm:$0xff]   ;;  %v966_v21 = vld [vmem:[%s1307_s1 + $0x30] sm:$0xff]   ;;  %v57_v23 = vld [vmem:[%s1305_s2 + $0x60] sm:$0xff] }
   0x8   :  { %896 = vmatprep.mubr.msk.bf16.mxu0 %vm181_vm1, %v962_v10  ;;  %v58_v22 = vld [vmem:[%s1305_s2 + $0x68] sm:$0xff]  ;;  %v60_v24 = vld [vmem:[%s1305_s2 + $0x78] sm:$0xff]  ;;  %v59_v25 = vld [vmem:[%s1305_s2 + $0x70] sm:$0xff] }
   0x9   :  { %v967_v26 = vld [vmem:[%s1307_s1 + $0x38] sm:$0xff]   ;;  %v396_v27 = vld [vmem:[%s1308_s4 + $0x8] sm:$0xff]  ;;  %v395_v28 = vld [vmem:[%s1308_s4] sm:$0xff] }
   0xa   :  { %88 = vperm.xlu1 %959, %v50_v9   ;;  %83 = vperm.xlu0 %958, %v49_v11   ;;  %v398_v29 = vld [vmem:[%s1308_s4 + $0x18] sm:$0xff]  ;;  %v397_v30 = vld [vmem:[%s1308_s4 + $0x10] sm:$0xff]  ;;  %v400_v31 = vld [vmem:[%s1308_s4 + $0x28] sm:$0xff] }
   0xb   :  { %v399_v32 = vld [vmem:[%s1308_s4 + $0x20] sm:$0xff]  ;;  %v402_v33 = vld [vmem:[%s1308_s4 + $0x38] sm:$0xff]  ;;  %v401_v34 = vld [vmem:[%s1308_s4 + $0x30] sm:$0xff] }
   0xc   :  { %v404_v35 = vld [vmem:[%s1308_s4 + $0x48] sm:$0xff]  ;;  %v403_v36 = vld [vmem:[%s1308_s4 + $0x40] sm:$0xff]  ;;  %v405_v38 = vld [vmem:[%s1308_s4 + $0x50] sm:$0xff] }
   0xd   :  { %v700_v37 = vld [vmem:[%s1309_s5] sm:$0xff]  ;;  %v406_v39 = vld [vmem:[%s1308_s4 + $0x58] sm:$0xff]  ;;  %v701_v40 = vld [vmem:[%s1309_s5 + $0x8] sm:$0xff] }
   0xe   :  { %98 = vperm.xlu1 %959, %v52_v12   ;;  %93 = vperm.xlu0 %958, %v51_v13   ;;  %v407_v41 = vld [vmem:[%s1308_s4 + $0x60] sm:$0xff]  ;;  %v702_v42 = vld [vmem:[%s1309_s5 + $0x10] sm:$0xff]  ;;  %v408_v43 = vld [vmem:[%s1308_s4 + $0x68] sm:$0xff] }
   0xf   :  { %897 = vmatmul.mubr.msk.bf16.gmra.mrb[4].mxu0 %vm181_vm1, %v963_v14  ;;  %v703_v44 = vld [vmem:[%s1309_s5 + $0x18] sm:$0xff]  ;;  %v409_v45 = vld [vmem:[%s1308_s4 + $0x70] sm:$0xff]  ;;  %v704_v46 = vld [vmem:[%s1309_s5 + $0x20] sm:$0xff] }
  0x10   :  { %900 = vmatprep.mubr.msk.bf16.mxu0 %vm181_vm1, %v964_v15  ;;  %v410_v47 = vld [vmem:[%s1308_s4 + $0x78] sm:$0xff]  ;;  %v705_v48 = vld [vmem:[%s1309_s5 + $0x28] sm:$0xff]  ;;  %v706_v50 = vld [vmem:[%s1309_s5 + $0x30] sm:$0xff] }
  0x11   :  { %v707_v49 = vld [vmem:[%s1309_s5 + $0x38] sm:$0xff]  ;;  %v709_v51 = vld [vmem:[%s1309_s5 + $0x48] sm:$0xff]  ;;  %v708_v52 = vld [vmem:[%s1309_s5 + $0x40] sm:$0xff] }
  0x12   :  { %108 = vperm.xlu1 %959, %v54_v16   ;;  %103 = vperm.xlu0 %958, %v53_v17   ;;  %v711_v53 = vld [vmem:[%s1309_s5 + $0x58] sm:$0xff]  ;;  %v710_v54 = vld [vmem:[%s1309_s5 + $0x50] sm:$0xff]  ;;  %v713_v55 = vld [vmem:[%s1309_s5 + $0x68] sm:$0xff] }
  0x13   :  { %v712_v56 = vld [vmem:[%s1309_s5 + $0x60] sm:$0xff]  ;;  %v715_v57 = vld [vmem:[%s1309_s5 + $0x78] sm:$0xff]  ;;  %v714_v58 = vld [vmem:[%s1309_s5 + $0x70] sm:$0xff] }
  0x14   :  { %v968_v59 = vld [vmem:[%s1310_s3] sm:$0xff]   ;;  %v969_v60 = vld [vmem:[%s1310_s3 + $0x10] sm:$0xff]  }
  0x15   :  { %928 = vmatprep.mubr.bf16.mxu1 %v969_v60 }
  0x16   :  { %118 = vperm.xlu1 %959, %v56_v18   ;;  %113 = vperm.xlu0 %958, %v55_v19  }
  0x17   :  { %901 = vmatmul.mubr.msk.bf16.gmra.mrb[8].mxu0 %vm181_vm1, %v965_v20 }
  0x18   :  { %904 = vmatprep.mubr.msk.bf16.mxu0 %vm181_vm1, %v966_v21 }
  0x1a   :  { %128 = vperm.xlu1 %959, %v58_v22   ;;  %123 = vperm.xlu0 %958, %v57_v23  }
  0x1e   :  { %138 = vperm.xlu1 %959, %v60_v24   ;;  %133 = vperm.xlu0 %958, %v59_v25  }
  0x1f   :  { %905 = vmatmul.mubr.msk.bf16.gmra.mrb[12].mxu0 %vm181_vm1, %v967_v26 }
  0x20   :  { %924 = vmatprep.mubr.bf16.mxu0 %v968_v59 }
  0x22   :  { %418 = vperm.xlu1 %959, %v396_v27   ;;  %413 = vperm.xlu0 %958, %v395_v28  }
  0x26   :  { %428 = vperm.xlu1 %959, %v398_v29   ;;  %423 = vperm.xlu0 %958, %v397_v30  }
  0x2a   :  { %438 = vperm.xlu1 %959, %v400_v31   ;;  %433 = vperm.xlu0 %958, %v399_v32  }
  0x2e   :  { %448 = vperm.xlu1 %959, %v402_v33   ;;  %443 = vperm.xlu0 %958, %v401_v34  }
  0x32   :  { %458 = vperm.xlu1 %959, %v404_v35   ;;  %453 = vperm.xlu0 %958, %v403_v36  }
  0x36   :  { %718 = vperm.xlu1 %959, %v700_v37   ;;  %463 = vperm.xlu0 %958, %v405_v38  }
  0x3a   :  { %468 = vperm.xlu1 %959, %v406_v39   ;;  %723 = vperm.xlu0 %958, %v701_v40  }
  0x3e   :  { %473 = vperm.xlu1 %959, %v407_v41   ;;  %728 = vperm.xlu0 %958, %v702_v42  }
  0x42   :  { %478 = vperm.xlu1 %959, %v408_v43   ;;  %733 = vperm.xlu0 %958, %v703_v44  }
  0x46   :  { %483 = vperm.xlu1 %959, %v409_v45   ;;  %738 = vperm.xlu0 %958, %v704_v46  }
  0x4a   :  { %488 = vperm.xlu1 %959, %v410_v47   ;;  %743 = vperm.xlu0 %958, %v705_v48  }
  0x4e   :  { %753 = vperm.xlu1 %959, %v707_v49   ;;  %748 = vperm.xlu0 %958, %v706_v50  }
  0x52   :  { %763 = vperm.xlu1 %959, %v709_v51   ;;  %758 = vperm.xlu0 %958, %v708_v52  }
  0x56   :  { %773 = vperm.xlu1 %959, %v711_v53   ;;  %768 = vperm.xlu0 %958, %v710_v54  }
  0x5a   :  { %783 = vperm.xlu1 %959, %v713_v55   ;;  %778 = vperm.xlu0 %958, %v712_v56  }
  0x5e   :  { %793 = vperm.xlu1 %959, %v715_v57   ;;  %788 = vperm.xlu0 %958, %v714_v58  }
  0x81   :  { %v64_v61 = vpop.permute.xlu0 %63  ;;  %v74_v62 = vpop.permute.xlu1 %73 }
  0x85   :  { %v69_v63 = vpop.permute.xlu0 %68  ;;  %v79_v0 = vpop.permute.xlu1 %78 }
  0x89   :  { %v84_v1 = vpop.permute.xlu0 %83  ;;  %v89_v2 = vpop.permute.xlu1 %88 }
  0x8d   :  { %v94_v3 = vpop.permute.xlu0 %93  ;;  %v99_v7 = vpop.permute.xlu1 %98 }
  0x91   :  { %v104_v16 = vpop.permute.xlu0 %103  ;;  %v109_v18 = vpop.permute.xlu1 %108 }
  0x95   :  { %v114_v27 = vpop.permute.xlu0 %113  ;;  %v119_v31 = vpop.permute.xlu1 %118 }
  0x99   :  { %v124_v42 = vpop.permute.xlu0 %123  ;;  %v129_v50 = vpop.permute.xlu1 %128 }
  0xda   :  { %v894_v4 = vpop.f32.mrb[0].mxu0 }
  0xdb   :  { %v253_v5 = vadd.f32 %v894_v4, %v74_v62  ;;  %v244_v6 = vpop.f32.mrb[1].mxu0 }
  0xdc   :  { %v245_v8 = vadd.f32 %v244_v6, %v64_v61  ;;  %v895_v9 = vpop.f32.mrb[2].mxu0 }
  0xdd   :  { %v309_v10 = vmul.f32 0.5, %v253_v5  ;;  %v256_v11 = vadd.f32 %v895_v9, %v79_v0  ;;  %v247_v12 = vpop.f32.mrb[3].mxu0 }
  0xde   :  { %v307_v13 = vmul.f32 0.5, %v245_v8  ;;  %v248_v14 = vadd.f32 %v247_v12, %v69_v63  ;;  %v134_v63 = vpop.permute.xlu0 %133 }
  0xdf   :  { %976 = vtanh.f32 %v309_v10  ;;  %v310_v15 = vmul.f32 0.5, %v256_v11 }
  0xe0   :  { %978 = vtanh.f32 %v307_v13  ;;  %v308_v17 = vmul.f32 0.5, %v248_v14 }
  0xe1   :  { %980 = vtanh.f32 %v310_v15 }
  0xe2   :  { %982 = vtanh.f32 %v308_v17  ;;  %v898_v19 = vpop.f32.mrb[4].mxu0 }
  0xe3   :  { %v269_v20 = vadd.f32 %v898_v19, %v94_v3  ;;  %v260_v21 = vpop.f32.mrb[5].mxu0 }
  0xe4   :  { %v261_v22 = vadd.f32 %v260_v21, %v84_v1  ;;  %v899_v23 = vpop.f32.mrb[6].mxu0 }
  0xe5   :  { %v313_v24 = vmul.f32 0.5, %v269_v20  ;;  %v272_v25 = vadd.f32 %v899_v23, %v99_v7  ;;  %v263_v26 = vpop.f32.mrb[7].mxu0  ;;  %v139_v7 = vpop.permute.xlu1 %138 }
  0xe6   :  { %v311_v28 = vmul.f32 0.5, %v261_v22  ;;  %v264_v29 = vadd.f32 %v263_v26, %v89_v2 }
  0xe7   :  { %984 = vtanh.f32 %v313_v24  ;;  %v314_v30 = vmul.f32 0.5, %v272_v25 }
  0xe8   :  { %986 = vtanh.f32 %v311_v28  ;;  %v312_v32 = vmul.f32 0.5, %v264_v29 }
  0xe9   :  { %v977_v33 = vpop.eup %976  ;;  %988 = vtanh.f32 %v314_v30 }
  0xea   :  { %v979_v34 = vpop.eup %978  ;;  %v341_v35 = vadd.f32 1.0, %v977_v33  ;;  %990 = vtanh.f32 %v312_v32  ;;  %v902_v36 = vpop.f32.mrb[8].mxu0 }
  0xeb   :  { %v981_v37 = vpop.eup %980  ;;  %v339_v38 = vadd.f32 1.0, %v979_v34  ;;  %v285_v39 = vadd.f32 %v902_v36, %v114_v27  ;;  %v276_v40 = vpop.f32.mrb[9].mxu0 }
  0xec   :  { %v983_v41 = vpop.eup %982  ;;  %v342_v43 = vadd.f32 1.0, %v981_v37  ;;  %v277_v44 = vadd.f32 %v276_v40, %v104_v16  ;;  %v903_v45 = vpop.f32.mrb[10].mxu0  ;;  %v357_v51 = vmul.f32 0.5, %v341_v35 }
  0xed   :  { %v340_v46 = vadd.f32 1.0, %v983_v41  ;;  %v317_v47 = vmul.f32 0.5, %v285_v39  ;;  %v288_v48 = vadd.f32 %v903_v45, %v119_v31  ;;  %v279_v49 = vpop.f32.mrb[11].mxu0  ;;  %v355_v55 = vmul.f32 0.5, %v339_v38 }
  0xee   :  { %v358_v52 = vmul.f32 0.5, %v342_v43  ;;  %v315_v53 = vmul.f32 0.5, %v277_v44  ;;  %v280_v54 = vadd.f32 %v279_v49, %v109_v18 }
  0xef   :  { %v356_v56 = vmul.f32 0.5, %v340_v46  ;;  %992 = vtanh.f32 %v317_v47  ;;  %v318_v57 = vmul.f32 0.5, %v288_v48 }
  0xf0   :  { %v388_v58 = vpack.c.bf16 %v358_v52, %v357_v51  ;;  %994 = vtanh.f32 %v315_v53  ;;  %v316_v59 = vmul.f32 0.5, %v280_v54  ;;  %v970_v53 = vld [vmem:[%s1310_s3 + $0x8] sm:$0xff]   ;;  %v971_v54 = vld [vmem:[%s1310_s3 + $0x18] sm:$0xff]  }
  0xf1   :  { %v985_v60 = vpop.eup %984  ;;  %v387_v61 = vpack.c.bf16 %v356_v56, %v355_v55  ;;  %996 = vtanh.f32 %v318_v57  ;;  %v972_v55 = vld [vmem:[%s1310_s3 + $0x20] sm:$0xff]   ;;  %v973_v56 = vld [vmem:[%s1310_s3 + $0x28] sm:$0xff]   ;;  %v974_v57 = vld [vmem:[%s1310_s3 + $0x30] sm:$0xff]  }
  0xf2   :  { %v987_v62 = vpop.eup %986  ;;  %v345_v0 = vadd.f32 1.0, %v985_v60  ;;  %998 = vtanh.f32 %v316_v59  ;;  %v906_v1 = vpop.f32.mrb[12].mxu0 }
  0xf3   :  { %v989_v2 = vpop.eup %988  ;;  %v343_v3 = vadd.f32 1.0, %v987_v62  ;;  %v301_v4 = vadd.f32 %v906_v1, %v134_v63  ;;  %v292_v5 = vpop.f32.mrb[13].mxu0  ;;  %908 = vmatprep.subr.bf16.mxu0 %v387_v61  ;;  %940 = vmatprep.subr.bf16.mxu1 %v387_v61 }
  0xf4   :  { %v991_v6 = vpop.eup %990  ;;  %v346_v8 = vadd.f32 1.0, %v989_v2  ;;  %v293_v9 = vadd.f32 %v292_v5, %v124_v42  ;;  %v907_v10 = vpop.f32.mrb[14].mxu0  ;;  %909 = vmatpush3.bf16.msra.mxu0 %v387_v61  ;;  %948 = vmatpush3.bf16.msra.mxu1 %v387_v61  ;;  %v361_v15 = vmul.f32 0.5, %v345_v0 }
  0xf5   :  { %v344_v11 = vadd.f32 1.0, %v991_v6  ;;  %v321_v12 = vmul.f32 0.5, %v301_v4  ;;  %v304_v13 = vadd.f32 %v907_v10, %v139_v7  ;;  %v295_v14 = vpop.f32.mrb[15].mxu0  ;;  %910 = vmatprep.subr.bf16.mxu0 %v388_v58  ;;  %941 = vmatprep.subr.bf16.mxu1 %v388_v58  ;;  %v359_v19 = vmul.f32 0.5, %v343_v3  ;;  %v414_v59 = vpop.permute.xlu0 %413 }
  0xf6   :  { %v362_v16 = vmul.f32 0.5, %v346_v8  ;;  %v319_v17 = vmul.f32 0.5, %v293_v9  ;;  %v296_v18 = vadd.f32 %v295_v14, %v129_v50  ;;  %v419_v60 = vpop.permute.xlu1 %418 }
  0xf7   :  { %v360_v20 = vmul.f32 0.5, %v344_v11  ;;  %1000 = vtanh.f32 %v321_v12  ;;  %v322_v21 = vmul.f32 0.5, %v304_v13 }
  0xf8   :  { %v390_v22 = vpack.c.bf16 %v362_v16, %v361_v15  ;;  %1002 = vtanh.f32 %v319_v17  ;;  %v320_v23 = vmul.f32 0.5, %v296_v18  ;;  %911 = vmatpush3.bf16.msra.mxu0 %v388_v58  ;;  %949 = vmatpush3.bf16.msra.mxu1 %v388_v58  ;;  %v975_v58 = vld [vmem:[%s1310_s3 + $0x38] sm:$0xff]  }
  0xf9   :  { %v993_v24 = vpop.eup %992  ;;  %v389_v25 = vpack.c.bf16 %v360_v20, %v359_v19  ;;  %1004 = vtanh.f32 %v322_v21  ;;  %v424_v61 = vpop.permute.xlu0 %423 }
  0xfa   :  { %v995_v26 = vpop.eup %994  ;;  %v349_v27 = vadd.f32 1.0, %v993_v24  ;;  %1006 = vtanh.f32 %v320_v23  ;;  %v429_v62 = vpop.permute.xlu1 %428 }
  0xfb   :  { %v997_v28 = vpop.eup %996  ;;  %v347_v29 = vadd.f32 1.0, %v995_v26  ;;  %912 = vmatprep.subr.bf16.mxu0 %v389_v25  ;;  %942 = vmatprep.subr.bf16.mxu1 %v389_v25 }
  0xfc   :  { %v999_v30 = vpop.eup %998  ;;  %v350_v31 = vadd.f32 1.0, %v997_v28  ;;  %913 = vmatpush3.bf16.msra.mxu0 %v389_v25  ;;  %950 = vmatpush3.bf16.msra.mxu1 %v389_v25  ;;  %v365_v33 = vmul.f32 0.5, %v349_v27 }
  0xfd   :  { %v348_v32 = vadd.f32 1.0, %v999_v30  ;;  %914 = vmatprep.subr.bf16.mxu0 %v390_v22  ;;  %943 = vmatprep.subr.bf16.mxu1 %v390_v22  ;;  %v363_v35 = vmul.f32 0.5, %v347_v29  ;;  %v434_v63 = vpop.permute.xlu0 %433 }
  0xfe   :  { %v366_v34 = vmul.f32 0.5, %v350_v31  ;;  %v439_v0 = vpop.permute.xlu1 %438 }
  0xff   :  { %v364_v36 = vmul.f32 0.5, %v348_v32 }
 0x100   :  { %v392_v37 = vpack.c.bf16 %v366_v34, %v365_v33  ;;  %915 = vmatpush3.bf16.msra.mxu0 %v390_v22  ;;  %951 = vmatpush3.bf16.msra.mxu1 %v390_v22 }
 0x101   :  { %v1001_v38 = vpop.eup %1000  ;;  %v391_v39 = vpack.c.bf16 %v364_v36, %v363_v35  ;;  %v444_v1 = vpop.permute.xlu0 %443 }
 0x102   :  { %v1003_v40 = vpop.eup %1002  ;;  %v353_v41 = vadd.f32 1.0, %v1001_v38  ;;  %v449_v2 = vpop.permute.xlu1 %448 }
 0x103   :  { %v1005_v42 = vpop.eup %1004  ;;  %v351_v43 = vadd.f32 1.0, %v1003_v40  ;;  %916 = vmatprep.subr.bf16.mxu0 %v391_v39  ;;  %944 = vmatprep.subr.bf16.mxu1 %v391_v39 }
 0x104   :  { %v1007_v44 = vpop.eup %1006  ;;  %v354_v45 = vadd.f32 1.0, %v1005_v42  ;;  %917 = vmatpush3.bf16.msra.mxu0 %v391_v39  ;;  %952 = vmatpush3.bf16.msra.mxu1 %v391_v39  ;;  %v369_v47 = vmul.f32 0.5, %v353_v41 }
 0x105   :  { %v352_v46 = vadd.f32 1.0, %v1007_v44  ;;  %918 = vmatprep.subr.bf16.mxu0 %v392_v37  ;;  %945 = vmatprep.subr.bf16.mxu1 %v392_v37  ;;  %v367_v49 = vmul.f32 0.5, %v351_v43  ;;  %v454_v3 = vpop.permute.xlu0 %453 }
 0x106   :  { %v370_v48 = vmul.f32 0.5, %v354_v45  ;;  %v459_v4 = vpop.permute.xlu1 %458 }
 0x107   :  { %v368_v50 = vmul.f32 0.5, %v352_v46 }
 0x108   :  { %v394_v51 = vpack.c.bf16 %v370_v48, %v369_v47  ;;  %919 = vmatpush3.bf16.msra.mxu0 %v392_v37  ;;  %953 = vmatpush3.bf16.msra.mxu1 %v392_v37 }
 0x109   :  { %v393_v52 = vpack.c.bf16 %v368_v50, %v367_v49  ;;  %v464_v5 = vpop.permute.xlu0 %463 }
 0x10a   :  { %v1284_v6 = vpop.permute.xlu1 %718 }
 0x10b   :  { %920 = vmatprep.subr.bf16.mxu0 %v393_v52  ;;  %946 = vmatprep.subr.bf16.mxu1 %v393_v52 }
 0x10c   :  { %921 = vmatpush3.bf16.msra.mxu0 %v393_v52  ;;  %954 = vmatpush3.bf16.msra.mxu1 %v393_v52 }
 0x10d   :  { %922 = vmatprep.subr.bf16.mxu0 %v394_v51  ;;  %947 = vmatprep.subr.bf16.mxu1 %v394_v51  ;;  %v1286_v7 = vpop.permute.xlu0 %723 }
 0x10e   :  { %v469_v8 = vpop.permute.xlu1 %468 }
 0x110   :  { %923 = vmatpush3.bf16.msra.mxu0 %v394_v51  ;;  %955 = vmatpush3.bf16.msra.mxu1 %v394_v51 }
 0x111   :  { %v1288_v9 = vpop.permute.xlu0 %728 }
 0x112   :  { %v474_v25 = vpop.permute.xlu1 %473 }
 0x113   :  { %925 = vmatmul.mubr.bf16.vlgmr.msra.gmra.mrb[16].mxu0 %v970_v53  ;;  %929 = vmatmul.mubr.bf16.vlgmr.msra.gmra.mrb[0].mxu1 %v971_v54 }
 0x114   :  { %932 = vmatprep.mubr.bf16.mxu1 %v972_v55 }
 0x115   :  { %v1290_v32 = vpop.permute.xlu0 %733 }
 0x116   :  { %v479_v37 = vpop.permute.xlu1 %478 }
 0x119   :  { %v1292_v43 = vpop.permute.xlu0 %738 }
 0x11a   :  { %v484_v49 = vpop.permute.xlu1 %483 }
 0x11b   :  { %933 = vmatmul.mubr.bf16.gmra.mrb[4].mxu1 %v973_v56 }
 0x11c   :  { %936 = vmatprep.mubr.bf16.mxu1 %v974_v57 }
 0x123   :  { %937 = vmatmul.mubr.bf16.gmra.mrb[8].mxu1 %v975_v58 }
 0x1e6   :  { %v926_v10 = vpop.f32.mrb[16].mxu0  ;;  %v930_v11 = vpop.f32.mrb[0].mxu1 }
 0x1e7   :  { %v582_v12 = vadd.f32 %v926_v10, %v424_v61  ;;  %v573_v13 = vpop.f32.mrb[17].mxu0  ;;  %v589_v14 = vpop.f32.mrb[1].mxu1  ;;  %v598_v29 = vadd.f32 %v930_v11, %v444_v1 }
 0x1e8   :  { %v574_v15 = vadd.f32 %v573_v13, %v414_v59  ;;  %v590_v16 = vadd.f32 %v589_v14, %v434_v63  ;;  %v927_v17 = vpop.f32.mrb[18].mxu0  ;;  %v931_v18 = vpop.f32.mrb[2].mxu1 }
 0x1e9   :  { %v638_v19 = vmul.f32 0.5, %v582_v12  ;;  %v585_v20 = vadd.f32 %v927_v17, %v429_v62  ;;  %v576_v21 = vpop.f32.mrb[19].mxu0  ;;  %v592_v22 = vpop.f32.mrb[3].mxu1  ;;  %v601_v33 = vadd.f32 %v931_v18, %v449_v2  ;;  %v642_v38 = vmul.f32 0.5, %v598_v29 }
 0x1ea   :  { %v636_v23 = vmul.f32 0.5, %v574_v15  ;;  %v577_v24 = vadd.f32 %v576_v21, %v419_v60  ;;  %v593_v27 = vadd.f32 %v592_v22, %v439_v0  ;;  %v640_v28 = vmul.f32 0.5, %v590_v16  ;;  %v744_v62 = vpop.permute.xlu0 %743 }
 0x1eb   :  { %v639_v26 = vmul.f32 0.5, %v585_v20  ;;  %1008 = vtanh.f32 %v638_v19  ;;  %v643_v41 = vmul.f32 0.5, %v601_v33 }
 0x1ec   :  { %1010 = vtanh.f32 %v636_v23  ;;  %v637_v30 = vmul.f32 0.5, %v577_v24  ;;  %v641_v34 = vmul.f32 0.5, %v593_v27 }
 0x1ed   :  { %1012 = vtanh.f32 %v639_v26 }
 0x1ee   :  { %v934_v31 = vpop.f32.mrb[4].mxu1  ;;  %1014 = vtanh.f32 %v640_v28  ;;  %v749_v22 = vpop.permute.xlu0 %748 }
 0x1ef   :  { %v605_v35 = vpop.f32.mrb[5].mxu1  ;;  %1016 = vtanh.f32 %v637_v30  ;;  %v614_v44 = vadd.f32 %v934_v31, %v464_v5 }
 0x1f0   :  { %v935_v36 = vpop.f32.mrb[6].mxu1  ;;  %v606_v39 = vadd.f32 %v605_v35, %v454_v3  ;;  %1018 = vtanh.f32 %v641_v34 }
 0x1f1   :  { %v608_v40 = vpop.f32.mrb[7].mxu1  ;;  %1020 = vtanh.f32 %v642_v38  ;;  %v617_v50 = vadd.f32 %v935_v36, %v469_v8  ;;  %v646_v56 = vmul.f32 0.5, %v614_v44 }
 0x1f2   :  { %v609_v42 = vadd.f32 %v608_v40, %v459_v4  ;;  %v644_v45 = vmul.f32 0.5, %v606_v39  ;;  %1022 = vtanh.f32 %v643_v41  ;;  %v489_v4 = vpop.permute.xlu1 %488  ;;  %v759_v39 = vpop.permute.xlu0 %758 }
 0x1f3   :  { %v647_v0 = vmul.f32 0.5, %v617_v50 }
 0x1f4   :  { %v645_v51 = vmul.f32 0.5, %v609_v42  ;;  %1024 = vtanh.f32 %v644_v45 }
 0x1f5   :  { %v1009_v46 = vpop.eup %1008 }
 0x1f6   :  { %v938_v47 = vpop.f32.mrb[8].mxu1  ;;  %v1011_v48 = vpop.eup %1010  ;;  %v670_v60 = vadd.f32 1.0, %v1009_v46  ;;  %1026 = vtanh.f32 %v645_v51 }
 0x1f7   :  { %v621_v52 = vpop.f32.mrb[9].mxu1  ;;  %v668_v53 = vadd.f32 1.0, %v1011_v48  ;;  %v1013_v55 = vpop.eup %1012  ;;  %1028 = vtanh.f32 %v646_v56  ;;  %v630_v5 = vadd.f32 %v938_v47, %v484_v49 }
 0x1f8   :  { %v939_v54 = vpop.f32.mrb[10].mxu1  ;;  %v622_v57 = vadd.f32 %v621_v52, %v474_v25  ;;  %v1015_v59 = vpop.eup %1014  ;;  %v671_v1 = vadd.f32 1.0, %v1013_v55  ;;  %v686_v10 = vmul.f32 0.5, %v670_v60  ;;  %1030 = vtanh.f32 %v647_v0 }
 0x1f9   :  { %v624_v58 = vpop.f32.mrb[11].mxu1  ;;  %v1017_v61 = vpop.eup %1016  ;;  %v684_v63 = vmul.f32 0.5, %v668_v53  ;;  %v672_v11 = vadd.f32 1.0, %v1015_v59  ;;  %v633_v16 = vadd.f32 %v939_v54, %v489_v4  ;;  %v650_v23 = vmul.f32 0.5, %v630_v5 }
 0x1fa   :  { %v669_v2 = vadd.f32 1.0, %v1017_v61  ;;  %v1019_v3 = vpop.eup %1018  ;;  %v648_v8 = vmul.f32 0.5, %v622_v57  ;;  %v625_v13 = vadd.f32 %v624_v58, %v479_v37  ;;  %v687_v17 = vmul.f32 0.5, %v671_v1  ;;  %v754_v29 = vpop.permute.xlu1 %753 }
 0x1fb   :  { %v1021_v14 = vpop.eup %1020  ;;  %v796_v15 = vmul.f32 %v1284_v6, %v684_v63  ;;  %v673_v19 = vadd.f32 1.0, %v1019_v3  ;;  %v798_v24 = vmul.f32 %v1288_v9, %v686_v10  ;;  %v688_v26 = vmul.f32 0.5, %v672_v11  ;;  %v769_v55 = vpop.permute.xlu0 %768 }
 0x1fc   :  { %v685_v12 = vmul.f32 0.5, %v669_v2  ;;  %v649_v20 = vmul.f32 0.5, %v625_v13  ;;  %v1023_v21 = vpop.eup %1022  ;;  %1032 = vtanh.f32 %v648_v8  ;;  %v674_v25 = vadd.f32 1.0, %v1021_v14 }
 0x1fd   :  { %v651_v30 = vmul.f32 0.5, %v633_v16  ;;  %v799_v6 = vmul.f32 %v1290_v32, %v687_v17  ;;  %v675_v31 = vadd.f32 1.0, %v1023_v21  ;;  %v800_v36 = vmul.f32 %v1292_v43, %v688_v26 }
 0x1fe   :  { %v797_v18 = vmul.f32 %v1286_v7, %v685_v12  ;;  %v1025_v28 = vpop.eup %1024  ;;  %1034 = vtanh.f32 %v649_v20  ;;  %v689_v7 = vmul.f32 0.5, %v673_v19  ;;  %v690_v35 = vmul.f32 0.5, %v674_v25  ;;  %v764_v46 = vpop.permute.xlu1 %763 }
 0x1ff   :  { %1036 = vtanh.f32 %v650_v23  ;;  %v676_v38 = vadd.f32 1.0, %v1025_v28  ;;  %v691_v40 = vmul.f32 0.5, %v675_v31  ;;  %v779_v10 = vpop.permute.xlu0 %778 }
 0x200   :  { %v812_v27 = vadd.f32 %v797_v18, %v796_v15  ;;  %v1027_v34 = vpop.eup %1026  ;;  %1038 = vtanh.f32 %v651_v30  ;;  %v801_v41 = vmul.f32 %v744_v62, %v689_v7  ;;  %v802_v32 = vmul.f32 %v749_v22, %v690_v35 }
 0x201   :  { %v1029_v9 = vpop.eup %1028  ;;  %v677_v44 = vadd.f32 1.0, %v1027_v34  ;;  %v692_v49 = vmul.f32 0.5, %v676_v38  ;;  %v803_v51 = vmul.f32 %v754_v29, %v691_v40  ;;  %v834_v7 = vstv %s1311_s6 }
 0x202   :  { %v813_v33 = vadd.f32 %v812_v27, %v798_v24  ;;  %v1031_v45 = vpop.eup %1030  ;;  %v678_v48 = vadd.f32 1.0, %v1029_v9  ;;  %v774_v61 = vpop.permute.xlu1 %773 }
 0x203   :  { %v679_v53 = vadd.f32 1.0, %v1031_v45  ;;  %v693_v43 = vmul.f32 0.5, %v677_v44  ;;  %v804_v57 = vmul.f32 %v759_v39, %v692_v49  ;;  %v789_v22 = vpop.permute.xlu0 %788 }
 0x204   :  { %v814_v37 = vadd.f32 %v813_v33, %v799_v6  ;;  %v694_v56 = vmul.f32 0.5, %v678_v48 }
 0x205   :  { %v695_v63 = vmul.f32 0.5, %v679_v53  ;;  %v805_v0 = vmul.f32 %v764_v46, %v693_v43 }
 0x206   :  { %v815_v42 = vadd.f32 %v814_v37, %v800_v36  ;;  %v1033_v50 = vpop.eup %1032  ;;  %v806_v3 = vmul.f32 %v769_v55, %v694_v56  ;;  %v784_v15 = vpop.permute.xlu1 %783 }
 0x207   :  { %v680_v59 = vadd.f32 1.0, %v1033_v50  ;;  %v807_v11 = vmul.f32 %v774_v61, %v695_v63 }
 0x208   :  { %v816_v47 = vadd.f32 %v815_v42, %v801_v41  ;;  %v1035_v54 = vpop.eup %1034 }
 0x209   :  { %v1037_v60 = vpop.eup %1036  ;;  %v681_v1 = vadd.f32 1.0, %v1035_v54  ;;  %v696_v8 = vmul.f32 0.5, %v680_v59 }
 0x20a   :  { %v817_v52 = vadd.f32 %v816_v47, %v802_v32  ;;  %v1039_v2 = vpop.eup %1038  ;;  %v682_v5 = vadd.f32 1.0, %v1037_v60  ;;  %v794_v25 = vpop.permute.xlu1 %793 }
 0x20b   :  { %v683_v13 = vadd.f32 1.0, %v1039_v2  ;;  %v697_v14 = vmul.f32 0.5, %v681_v1  ;;  %v808_v17 = vmul.f32 %v779_v10, %v696_v8 }
 0x20c   :  { %v818_v58 = vadd.f32 %v817_v52, %v803_v51  ;;  %v698_v16 = vmul.f32 0.5, %v682_v5 }
 0x20d   :  { %v699_v20 = vmul.f32 0.5, %v683_v13  ;;  %v809_v21 = vmul.f32 %v784_v15, %v697_v14 }
 0x20e   :  { %v819_v62 = vadd.f32 %v818_v58, %v804_v57  ;;  %v810_v23 = vmul.f32 %v789_v22, %v698_v16 }
 0x20f   :  { %v811_v26 = vmul.f32 %v794_v25, %v699_v20 }
 0x210   :  { %v820_v4 = vadd.f32 %v819_v62, %v805_v0 }
 0x212   :  { %v821_v12 = vadd.f32 %v820_v4, %v806_v3 }
 0x214   :  { %v822_v18 = vadd.f32 %v821_v12, %v807_v11 }
 0x216   :  { %v823_v19 = vadd.f32 %v822_v18, %v808_v17 }
 0x218   :  { %v824_v24 = vadd.f32 %v823_v19, %v809_v21 }
 0x21a   :  { %v825_v27 = vadd.f32 %v824_v24, %v810_v23 }
 0x21c   :  { %v826_v28 = vadd.f32 %v825_v27, %v811_v26 }
 0x21e   :  { %v827_v29 = vrot.slane %v826_v28, 4 }
 0x220   :  { %v828_v30 = vadd.f32 %v827_v29, %v826_v28 }
 0x222   :  { %v829_v6 = vrot.slane %v828_v30, 2 }
 0x224   :  { %v830_v31 = vadd.f32 %v829_v6, %v828_v30 }
 0x226   :  { %v831_v33 = vrot.slane %v830_v31, 1 }
 0x228   :  { %v832_v34 = vadd.f32 %v831_v33, %v830_v31 }
 0x22a   :  { %v835_v35 = vadd.f32 %v834_v7, %v832_v34 }
 0x22c   :  { %836 = vst [vmem:[%s1312_s7] sm:$0x1] %v835_v35 }

</bundles_post_ra>
